<compile_context>
chip_gen: v5e
topology: v5e:2x2
jax: 0.10.0
libtpu: 0.0.40
codegen_flags: <defaults>
</compile_context>

<pallas_src>
import functools

import jax
import jax.numpy as jnp
from jax.experimental import pallas as pl
from jax.experimental.pallas import tpu as pltpu


def _disc_kernel(x_ref, w1_ref, b1_ref, w2_ref, b2_ref, o_ref, *,
                 reduce_out, lhs_dtype):
    """One batch tile of sigmoid(relu(x @ W1 + b1) @ W2 + b2)."""
    xv = x_ref[...]
    if lhs_dtype is not None and xv.dtype != lhs_dtype:
        # Cast the tile in VMEM only (MXU benefit); x stays f32 in HBM so no
        # extra HBM traffic is generated by the wrapper.
        xv = xv.astype(lhs_dtype)

    # Layer 1: MXU matmul, f32 accumulation; bias + relu on the VPU in f32.
    h = jnp.dot(xv, w1_ref[...], preferred_element_type=jnp.float32)
    h = jnp.maximum(h + b1_ref[...], 0.0)                    # (TB,H) + (1,H)

    if reduce_out:
        # output_dim == 1: a (TB,H)x(H,1) jnp.dot would pay a full MXU
        # push/pop to produce one output lane.  Do it on the VPU (multiply)
        # + XLU (lane-axis reduction) instead; b2 is a scalar from SMEM.
        logits = jnp.sum(h * w2_ref[...], axis=-1, keepdims=True) + b2_ref[0]
    else:
        logits = jnp.dot(h, w2_ref[...],
                         preferred_element_type=jnp.float32) + b2_ref[...]

    o_ref[...] = jax.nn.sigmoid(logits).astype(o_ref.dtype)


def _vmem_budget_and_limit():
    """(budget for streamed buffers, scoped-VMEM request), generation-aware."""
    try:
        cap = int(pltpu.get_tpu_info().vmem_capacity_bytes)   # per-core VMEM
    except Exception:
        cap = 64 * 1024 * 1024                                # v7x per-TC floor
    budget = int(min(cap // 3, 24 * 1024 * 1024))
    limit = int(max(24 * 1024 * 1024, min(cap - (12 << 20), 48 << 20)))
    return budget, limit


def discriminator_forward(x, w1, b1, w2, b2, *, block_b=None, mxu_bf16=False,
                          x_buffers=2):
    """Forward pass of the Discriminator.

    x : (..., image_size); w1: (image_size, hidden); b1: (hidden,);
    w2: (hidden, output_dim); b2: (output_dim,).  Returns (..., output_dim) f32.
    """
    K = x.shape[-1]
    lead = x.shape[:-1]
    x2 = x.reshape(-1, K)                 # metadata-only for contiguous inputs
    B = x2.shape[0]
    H = w1.shape[1]
    O = w2.shape[1]
    reduce_out = (O == 1)

    # Weights are tiny -> casting them in the wrapper is free.  x is NOT cast.
    lhs_dtype = jnp.bfloat16 if (mxu_bf16 and x2.dtype == jnp.float32) else None
    w_dtype = jnp.bfloat16 if mxu_bf16 else x2.dtype
    w1_c = w1.astype(w_dtype)
    b1_2d = b1.reshape(1, H).astype(jnp.float32)
    if reduce_out:
        w2_in = w2.reshape(1, H).astype(jnp.float32)   # VPU/XLU path row
        b2_in = b2.reshape(1).astype(jnp.float32)      # SMEM scalar
    else:
        w2_in = w2.astype(jnp.float32)
        b2_in = b2.reshape(1, O).astype(jnp.float32)

    kernel = functools.partial(_disc_kernel, reduce_out=reduce_out,
                               lhs_dtype=lhs_dtype)

    budget, vmem_limit = _vmem_budget_and_limit()
    x_bytes = jnp.dtype(x2.dtype).itemsize
    weight_bytes = (K * H * jnp.dtype(w_dtype).itemsize
                    + 4 * H + 4 * (H if reduce_out else H * O) + 4 * O)

    n_buf = max(2, int(x_buffers))
    # Per streamed row: n_buf x-buffers + double-buffered out row + a
    # conservative allowance for the f32 intermediates (h, relu, h*w2, ...).
    per_row = n_buf * K * x_bytes + 2 * O * 4 + 6 * H * 4 + 64
    if block_b is None:
        block_b = (budget - weight_bytes) // max(per_row, 1)
        block_b = int(max(1024, min(32768, block_b)))
    # Never let the streamed buffers outgrow the scoped-VMEM request.
    hard_cap = (vmem_limit - weight_bytes - (4 << 20)) // max(per_row, 1)
    block_b = int(min(int(block_b), max(hard_cap, 8)))
    block_b = max(8, (block_b // 8) * 8)                 # sublane multiple

    SINGLE_SHOT_MAX = 1024   # above this, prefer the gridded path (v7x: 2 TCs)

    if B <= min(block_b, SINGLE_SHOT_MAX):
        # ---- single-shot path: no grid => no pipeline bookkeeping, no
        #      double buffers; every operand sits once in VMEM; no padding.
        b2_space = (pltpu.MemorySpace.SMEM if reduce_out
                    else pltpu.MemorySpace.VMEM)
        out = pl.pallas_call(
            kernel,
            out_shape=jax.ShapeDtypeStruct((B, O), jnp.float32),
            in_specs=[
                pl.BlockSpec(memory_space=pltpu.MemorySpace.VMEM),  # x
                pl.BlockSpec(memory_space=pltpu.MemorySpace.VMEM),  # w1
                pl.BlockSpec(memory_space=pltpu.MemorySpace.VMEM),  # b1
                pl.BlockSpec(memory_space=pltpu.MemorySpace.VMEM),  # w2
                pl.BlockSpec(memory_space=b2_space),                # b2
            ],
            out_specs=pl.BlockSpec(memory_space=pltpu.MemorySpace.VMEM),
        )(x2, w1_c, b1_2d, w2_in, b2_in)
        return out.reshape(lead + (O,))

    # ---- batch-tiled path: weights/biases resident (block (0,0) each step),
    #      x / out streamed + auto-pipelined, non-divisible grid (ragged last
    #      tile handled by masked partial DMAs -> no jnp.pad copies of x).
    two_tile_cap = ((-(-B // 2) + 7) // 8) * 8           # >= 2 grid steps
    block_b = max(8, min(block_b, two_tile_cap))
    n_tiles = pl.cdiv(B, block_b)

    if int(x_buffers) > 2:
        x_spec = pl.BlockSpec((block_b, K), lambda i: (i, 0),
                              pipeline_mode=pl.Buffered(int(x_buffers)))
    else:
        x_spec = pl.BlockSpec((block_b, K), lambda i: (i, 0))

    if reduce_out:
        w2_spec = pl.BlockSpec((1, H), lambda i: (0, 0))
        b2_spec = pl.BlockSpec(memory_space=pltpu.MemorySpace.SMEM)
    else:
        w2_spec = pl.BlockSpec((H, O), lambda i: (0, 0))
        b2_spec = pl.BlockSpec((1, O), lambda i: (0, 0))

    out = pl.pallas_call(
        kernel,
        out_shape=jax.ShapeDtypeStruct((B, O), jnp.float32),
        grid=(n_tiles,),
        in_specs=[
            x_spec,                                      # x: streamed
            pl.BlockSpec((K, H), lambda i: (0, 0)),      # w1: resident
            pl.BlockSpec((1, H), lambda i: (0, 0)),      # b1: resident
            w2_spec,                                     # w2: resident
            b2_spec,                                     # b2: resident
        ],
        out_specs=pl.BlockSpec((block_b, O), lambda i: (i, 0)),
        compiler_params=pltpu.CompilerParams(
            dimension_semantics=("parallel",),           # megacore-shardable
            vmem_limit_bytes=vmem_limit,                 # lift v5e's 16 MiB cap
        ),
    )(x2, w1_c, b1_2d, w2_in, b2_in)
    return out.reshape(lead + (O,))


def init_params(key, image_size, hidden_dim, output_dim):
    """Deterministic init mimicking nn.Linear's uniform(-1/sqrt(fan_in), ...)."""
    k1, k2, k3, k4 = jax.random.split(key, 4)
    lim1 = 1.0 / jnp.sqrt(image_size)
    lim2 = 1.0 / jnp.sqrt(hidden_dim)
    # Stored as (in, out) == transpose of PyTorch's (out, in) weight.
    w1 = jax.random.uniform(k1, (image_size, hidden_dim), jnp.float32, -lim1, lim1)
    b1 = jax.random.uniform(k2, (hidden_dim,), jnp.float32, -lim1, lim1)
    w2 = jax.random.uniform(k3, (hidden_dim, output_dim), jnp.float32, -lim2, lim2)
    b2 = jax.random.uniform(k4, (output_dim,), jnp.float32, -lim2, lim2)
    return w1, b1, w2, b2


if __name__ == "__main__":
    image_size, hidden_dim, output_dim = 64, 32, 1

    key = jax.random.PRNGKey(0)
    kx1, kx2, kp = jax.random.split(key, 3)
    w1, b1, w2, b2 = init_params(kp, image_size, hidden_dim, output_dim)

    def ref_fwd(xx):
        return jax.nn.sigmoid(jnp.maximum(xx @ w1 + b1, 0.0) @ w2 + b2)

    # 1) Tiny batch -> grid-free single-shot path, f32, SMEM scalar bias.
    x_small = jax.random.normal(kx1, (4, image_size), jnp.float32)
    out_small = jax.block_until_ready(
        discriminator_forward(x_small, w1, b1, w2, b2))
    assert out_small.shape == (4, output_dim)
    assert jnp.allclose(out_small, ref_fwd(x_small), atol=2e-5, rtol=1e-5)

    # 2) Larger batch -> batch-tiled path: auto tile size, >= 2 "parallel"
    #    grid steps, ragged last tile handled by masked writes (no jnp.pad,
    #    no wrapper-side astype of x).
    x_big = jax.random.normal(kx2, (2500, image_size), jnp.float32)
    out_big = jax.block_until_ready(
        discriminator_forward(x_big, w1, b1, w2, b2))
    assert out_big.shape == (2500, output_dim)
    assert jnp.allclose(out_big, ref_fwd(x_big), atol=2e-5, rtol=1e-5)

    # 3) Same tiled path with the in-kernel bf16 cast for the MXU
    #    (f32 accumulation); x remains f32 in HBM.
    out_bf16 = jax.block_until_ready(
        discriminator_forward(x_big, w1, b1, w2, b2, mxu_bf16=True))
    assert out_bf16.shape == (2500, output_dim)
    assert jnp.allclose(out_bf16, ref_fwd(x_big), atol=1e-2, rtol=1e-2)

    print("KERNEL_OK")
</pallas_src>

<mosaic_0001>
module attributes {stable_mosaic.version = 11 : i64} {
  func.func @_disc_kernel(%arg0: memref<4x64xf32, #tpu.memory_space<vmem>>, %arg1: memref<64x32xf32, #tpu.memory_space<vmem>>, %arg2: memref<1x32xf32, #tpu.memory_space<vmem>>, %arg3: memref<1x32xf32, #tpu.memory_space<vmem>>, %arg4: memref<1xf32, #tpu.memory_space<smem>>, %arg5: memref<4x1xf32, #tpu.memory_space<vmem>>) attributes {dimension_semantics = [], scalar_prefetch = 0 : i64, scratch_operands = 0 : i64, tpu.core_type = #tpu.core_type<tc>} {
    %c0 = arith.constant 0 : index
    %c0_0 = arith.constant 0 : index
    %0 = vector.load %arg0[%c0, %c0_0] : memref<4x64xf32, #tpu.memory_space<vmem>>, vector<4x64xf32>
    %c0_1 = arith.constant 0 : index
    %c0_2 = arith.constant 0 : index
    %1 = vector.load %arg1[%c0_1, %c0_2] : memref<64x32xf32, #tpu.memory_space<vmem>>, vector<64x32xf32>
    %cst = arith.constant dense<0.000000e+00> : vector<4x32xf32>
    %2 = tpu.matmul %0, %1, %cst {dimension_numbers = #tpu.dot_dimension_numbers<[1], [0], [0], [1], [0, 0, 1, 1], [], []>} : vector<4x64xf32>, vector<64x32xf32>, vector<4x32xf32> -> vector<4x32xf32>
    %c0_3 = arith.constant 0 : index
    %c0_4 = arith.constant 0 : index
    %3 = vector.load %arg2[%c0_3, %c0_4] : memref<1x32xf32, #tpu.memory_space<vmem>>, vector<1x32xf32>
    %4 = vector.broadcast %3 : vector<1x32xf32> to vector<4x32xf32>
    %5 = arith.addf %2, %4 : vector<4x32xf32>
    %cst_5 = arith.constant 0.000000e+00 : f32
    %6 = vector.broadcast %cst_5 : f32 to vector<4x32xf32>
    %7 = arith.maximumf %5, %6 : vector<4x32xf32>
    %c0_6 = arith.constant 0 : index
    %c0_7 = arith.constant 0 : index
    %8 = vector.load %arg3[%c0_6, %c0_7] : memref<1x32xf32, #tpu.memory_space<vmem>>, vector<1x32xf32>
    %9 = vector.broadcast %8 : vector<1x32xf32> to vector<4x32xf32>
    %10 = arith.mulf %7, %9 : vector<4x32xf32>
    %cst_8 = arith.constant dense<0.000000e+00> : vector<4xf32>
    %11 = vector.multi_reduction <add>, %10, %cst_8 [1] : vector<4x32xf32> to vector<4xf32>
    %12 = vector.shape_cast %11 : vector<4xf32> to vector<4x1xf32>
    %c0_9 = arith.constant 0 : index
    %13 = memref.load %arg4[%c0_9] : memref<1xf32, #tpu.memory_space<smem>>
    %14 = vector.broadcast %13 : f32 to vector<4x1xf32>
    %15 = arith.addf %12, %14 : vector<4x1xf32>
    %16 = arith.negf %15 : vector<4x1xf32>
    %17 = math.exp %16 : vector<4x1xf32>
    %cst_10 = arith.constant 1.000000e+00 : f32
    %18 = vector.broadcast %cst_10 : f32 to vector<4x1xf32>
    %19 = arith.addf %18, %17 : vector<4x1xf32>
    %20 = arith.divf %18, %19 : vector<4x1xf32>
    %c0_11 = arith.constant 0 : index
    %c0_12 = arith.constant 0 : index
    %21 = vector.load %arg5[%c0_11, %c0_12] : memref<4x1xf32, #tpu.memory_space<vmem>>, vector<4x1xf32>
    tpu.vector_store %arg5[%c0_11, %c0_12], %20 {strides = array<i32>} : memref<4x1xf32, #tpu.memory_space<vmem>>, vector<4x1xf32>,
    return
  }
}

</mosaic_0001>

<bundles_post_ra>
// kernel: tpu_custom_call.1
= control target key start
LH: loop header
LB: loop body
LE: loop exit
PB: predicated region body
PF: predicated region fallthrough
CT: control target
= control target key end

     0   :  { %vm34_vm0 = vcmask 523264   ;;  %vm64_vm1 = vcmask 257024   ;;  %vm90_vm5 = vcmask 3072   ;;  %s173_s1 = inlined_call_operand.vmem [shape: f32[64,32], index: 1, kind: input, shape index: {}]   ;;  %s174_s2 = inlined_call_operand.vmem [shape: f32[1,32], index: 2, kind: input, shape index: {}]   ;;  %s175_s0 = inlined_call_operand.vmem [shape: f32[4,64], index: 0, kind: input, shape index: {}]   ;;  %s176_s3 = inlined_call_operand.vmem [shape: f32[1,32], index: 3, kind: input, shape index: {}]   ;;  %s177_s4 = inlined_call_operand.<no memory space> [shape: f32[1], index: 4, kind: input, shape index: {}]   ;;  %s178_s5 = inlined_call_operand.vmem [shape: f32[4,1], index: 5, kind: output, shape index: {}]  }
   0x1   :  { %v29_v0 = vld [vmem:[%s173_s1 + $0x38] sm:$0xff]  ;;  %v28_v1 = vld [vmem:[%s173_s1 + $0x30] sm:$0xff]  ;;  %v27_v2 = vld [vmem:[%s173_s1 + $0x28] sm:$0xff]  ;;  %v69_v16 = vstv %s177_s4 }
   0x2   :  { %46 = vmatpush.msra.mxu0 %v29_v0  ;;  %v26_v3 = vld [vmem:[%s173_s1 + $0x20] sm:$0xff]  ;;  %v25_v4 = vld [vmem:[%s173_s1 + $0x18] sm:$0xff]  ;;  %v24_v5 = vld [vmem:[%s173_s1 + $0x10] sm:$0xff] }
   0x3   :  { %v23_v6 = vld [vmem:[%s173_s1 + $0x8] sm:$0xff]  ;;  %v22_v7 = vld [vmem:[%s173_s1] sm:$0xff] }
   0x4   :  { %47 = vmatpush.msra.mxu0 %v28_v1  ;;  %v21_v8 = vld [vmem:[%s175_s0] sm:$0xf] }
   0x5   :  { %v98_v9 = vld [vmem:[%s174_s2] ss:$0 sm:$0xff] }
   0x6   :  { %48 = vmatpush.msra.mxu0 %v27_v2  ;;  %v99_v12 = vld [vmem:[%s176_s3] ss:$0 sm:$0xff] }
   0x8   :  { %49 = vmatpush.msra.mxu0 %v26_v3 }
   0xa   :  { %50 = vmatpush.msra.mxu0 %v25_v4 }
   0xc   :  { %51 = vmatpush.msra.mxu0 %v24_v5 }
   0xe   :  { %52 = vmatpush.msra.mxu0 %v23_v6 }
  0x10   :  { %53 = vmatpush.msra.mxu0 %v22_v7 }
  0x11   :  { %96 = vmatmul.msk.f32.vlgmr.msra.gmra.mxu0 %vm34_vm0, %v21_v8 }
  0x8e   :  { %v55_v10 = vpop.f32.mrf.mxu0 }
  0x8f   :  { %v56_v11 = vadd.f32 %v98_v9, %v55_v10 }
  0x91   :  { %v58_v13 = vmax.f32 %v56_v11, 0.0 }
  0x93   :  { %v63_v14 = vmul.f32 %v99_v12, %v58_v13 }
  0x95   :  { %v65_v15 = vsel %vm64_vm1, %v63_v14, 0.0 }
  0x96   :  { %66 = vadd.xlane.f32.xlu0 %v65_v15 }
 0x109   :  { %v67_v17 = vpop.xlane.xlu0 %66 }
 0x10a   :  { %v70_v18 = vadd.f32 %v69_v16, %v67_v17 }
 0x10c   :  { %v97_v19 = vmul.f32 -1.442695, %v70_v18 }
 0x10e   :  { %100 = vpow2.f32 %v97_v19 }
 0x114   :  { %v101_v20 = vpop.eup %100 }
 0x115   :  { %v74_v21 = vadd.f32 1.0, %v101_v20 }
 0x117   :  { %102 = vrcp.f32 %v74_v21  ;;  %v86_v25 = vand.u32 2147483648, %v74_v21  ;;  %v84_v27 = vand.u32 2147483647, %v74_v21  ;;  %vm80_vm3 = vweird.f32 %v74_v21 }
 0x119   :  { %v87_v29 = vor.u32 1.1754944e-38, %v86_v25  ;;  %vm85_vm6 = vcmp.eq.f32.partialorder %v84_v27, 8.507059e+37 }
 0x11d   :  { %v103_v22 = vpop.eup %102 }
 0x11e   :  { %v76_v23 = vmul.f32 %v103_v22, %v74_v21  ;;  %vm81_vm2 = vweird.f32 %v103_v22 }
 0x11f   :  { %vm82_vm4 = vmor %vm80_vm3, %vm81_vm2 }
 0x120   :  { %v77_v24 = vsub.f32 1.0, %v76_v23 }
 0x122   :  { %v78_v26 = vmul.f32 %v103_v22, %v77_v24 }
 0x124   :  { %v79_v28 = vadd.f32 %v103_v22, %v78_v26 }
 0x126   :  { %v83_v30 = vsel %vm82_vm4, %v103_v22, %v79_v28 }
 0x127   :  { %v88_v31 = vsel %vm85_vm6, %v87_v29, %v83_v30 }
 0x128   :  { %91 = vst.msk [vmem:[%s178_s5] sm:$0xf] %vm90_vm5, %v88_v31 }

</bundles_post_ra>
